<compile_context>
chip_gen: v6e
topology: v6e:2x2x1
jax: 0.10.0
libtpu: 0.0.40
codegen_flags: <defaults>
</compile_context>

<pallas_src>
import jax
import jax.numpy as jnp
from jax.experimental import pallas as pl
from jax.experimental.pallas import tpu as pltpu


def _pick_channel_block(C):
    # Channel block must satisfy the (8,128) tiling rules on both the input
    # block (second-to-last dim) and the fused output block (last dim):
    # either a multiple of 128 or the full channel extent.
    if C > 256 and C % 256 == 0:
        return 256
    if C > 256 and C % 128 == 0:
        return 128
    return C


def adaptive_concat_pool3d(x, *, spatial_tile=None, vmem_limit_bytes=48 * 1024 * 1024):
    """x: (N, C, D, H, W) -> (N, 2*C, 1, 1, 1), matching the PyTorch module."""
    N, C, D, H, W = x.shape
    S = D * H * W
    x_flat = x.reshape(N, C, S)  # glue reshape in plain JAX

    CB = _pick_channel_block(C)
    num_c = C // CB

    itemsize = jnp.dtype(x.dtype).itemsize
    per_buffer_budget = 12 * 1024 * 1024  # bytes per pipelined input buffer
    s_pad = ((S + 127) // 128) * 128
    ts_cap = max(128, (per_buffer_budget // (CB * itemsize)) // 128 * 128)
    TS = spatial_tile if spatial_tile is not None else min(s_pad, ts_cap)
    assert TS % 128 == 0, "spatial tile must be lane-aligned (multiple of 128)"
    num_s = -(-S // TS)

    needs_mask = (S % TS) != 0
    if jnp.issubdtype(x.dtype, jnp.floating):
        neg_fill = float("-inf")
    else:
        neg_fill = int(jnp.iinfo(x.dtype).min)
    inv_s = 1.0 / float(S)

    def kernel(x_ref, o_ref, m_acc, s_acc):
        s_idx = pl.program_id(2)

        @pl.when(s_idx == 0)
        def _init():
            m_acc[...] = jnp.full(m_acc.shape, -jnp.inf, dtype=jnp.float32)
            s_acc[...] = jnp.zeros(s_acc.shape, dtype=jnp.float32)

        x_blk = x_ref[...]  # (1, CB, TS), native dtype
        if needs_mask:
            lane = jax.lax.broadcasted_iota(jnp.int32, x_blk.shape, 2)
            valid = (s_idx * TS + lane) < S
            x_max = jnp.where(valid, x_blk, jnp.asarray(neg_fill, dtype=x_blk.dtype))
            x_sum = jnp.where(valid, x_blk, jnp.zeros_like(x_blk))
        else:
            x_max = x_blk
            x_sum = x_blk

        # Fold the f32 upcast into the reductions (no full-tile f32 copy).
        m_acc[...] = jnp.maximum(m_acc[...], jnp.max(x_max, axis=-1).astype(jnp.float32))
        s_acc[...] = s_acc[...] + jnp.sum(x_sum, axis=-1, dtype=jnp.float32)

        @pl.when(s_idx == pl.num_programs(2) - 1)
        def _finalize():
            mx = m_acc[...]                        # (1, CB) f32
            av = s_acc[...] * jnp.float32(inv_s)   # (1, CB) f32
            o_ref[...] = jnp.concatenate([mx, av], axis=0)[None].astype(o_ref.dtype)

    out = pl.pallas_call(
        kernel,
        out_shape=jax.ShapeDtypeStruct((N, 2, C), x.dtype),
        grid=(N, num_c, num_s),
        in_specs=[pl.BlockSpec((1, CB, TS), lambda n, c, s: (n, c, s))],
        out_specs=pl.BlockSpec((1, 2, CB), lambda n, c, s: (n, 0, c)),
        scratch_shapes=[
            pltpu.VMEM((1, CB), jnp.float32),  # running max
            pltpu.VMEM((1, CB), jnp.float32),  # running sum
        ],
        compiler_params=pltpu.CompilerParams(
            dimension_semantics=("parallel", "parallel", "arbitrary"),
            vmem_limit_bytes=vmem_limit_bytes,
        ),
    )(x_flat)

    # (N, 2, C) -> (N, 2*C, 1, 1, 1): channels ordered [max_0..max_{C-1},
    # avg_0..avg_{C-1}] == torch.cat([maxpool, avgpool], dim=1).
    return out.reshape(N, 2 * C, 1, 1, 1)


def _reference(x):
    mx = jnp.max(x, axis=(2, 3, 4), keepdims=True)
    av = jnp.mean(x, axis=(2, 3, 4), keepdims=True)
    return jnp.concatenate([mx, av], axis=1)


if __name__ == "__main__":
    key = jax.random.PRNGKey(0)
    k1, k2 = jax.random.split(key)

    # Test 1: small lane-aligned shape (S = 256), single spatial chunk.
    N, C, D, H, W = 2, 4, 4, 8, 8
    x1 = jax.random.normal(k1, (N, C, D, H, W), dtype=jnp.float32)
    out1 = jax.block_until_ready(adaptive_concat_pool3d(x1))
    ref1 = _reference(x1)
    assert out1.shape == (N, 2 * C, 1, 1, 1), out1.shape
    assert jnp.allclose(out1, ref1, atol=1e-5, rtol=1e-5), "mismatch vs reference (test 1)"

    # Test 2: ragged S (288 over TS=128 -> 3 chunks, masked tail), N=1.
    x2 = jax.random.normal(k2, (1, 4, 4, 8, 9), dtype=jnp.float32)
    out2 = jax.block_until_ready(adaptive_concat_pool3d(x2, spatial_tile=128))
    ref2 = _reference(x2)
    assert out2.shape == (1, 8, 1, 1, 1), out2.shape
    assert jnp.allclose(out2, ref2, atol=1e-5, rtol=1e-5), "mismatch vs reference (test 2)"

    print("KERNEL_OK")
</pallas_src>

<mosaic_0001>
module attributes {stable_mosaic.version = 11 : i64} {
  func.func @kernel(%arg0: i32, %arg1: i32, %arg2: i32, %arg3: memref<1x4x256xf32, #tpu.memory_space<vmem>>, %arg4: memref<1x2x4xf32, #tpu.memory_space<vmem>>, %arg5: memref<1x4xf32, #tpu.memory_space<vmem>>, %arg6: memref<1x4xf32, #tpu.memory_space<vmem>>) attributes {dimension_semantics = [#tpu.dimension_semantics<parallel>, #tpu.dimension_semantics<parallel>, #tpu.dimension_semantics<arbitrary>], iteration_bounds = array<i64: 2, 1, 1>, scalar_prefetch = 0 : i64, scratch_operands = 2 : i64, tpu.core_type = #tpu.core_type<tc>, window_params = [{transform_indices = @transform_0, window_bounds = array<i64: 1, 4, 256>}, {transform_indices = @transform_1, window_bounds = array<i64: 1, 2, 4>}]} {
    %c0_i32 = arith.constant 0 : i32
    %0 = arith.cmpi eq, %arg2, %c0_i32 : i32
    %1 = arith.extui %0 : i1 to i32
    %c0_i32_0 = arith.constant 0 : i32
    %2 = arith.cmpi ne, %1, %c0_i32_0 : i32
    scf.if %2 {
      %cst_14 = arith.constant 0xFF800000 : f32
      %15 = vector.broadcast %cst_14 : f32 to vector<1x4xf32>
      %c0_15 = arith.constant 0 : index
      %c0_16 = arith.constant 0 : index
      %16 = vector.load %arg5[%c0_15, %c0_16] : memref<1x4xf32, #tpu.memory_space<vmem>>, vector<1x4xf32>
      tpu.vector_store %arg5[%c0_15, %c0_16], %15 {strides = array<i32>} : memref<1x4xf32, #tpu.memory_space<vmem>>, vector<1x4xf32>,
      %cst_17 = arith.constant 0.000000e+00 : f32
      %17 = vector.broadcast %cst_17 : f32 to vector<1x4xf32>
      %c0_18 = arith.constant 0 : index
      %c0_19 = arith.constant 0 : index
      %18 = vector.load %arg6[%c0_18, %c0_19] : memref<1x4xf32, #tpu.memory_space<vmem>>, vector<1x4xf32>
      tpu.vector_store %arg6[%c0_18, %c0_19], %17 {strides = array<i32>} : memref<1x4xf32, #tpu.memory_space<vmem>>, vector<1x4xf32>,
    } else {
    }
    %c0 = arith.constant 0 : index
    %c0_1 = arith.constant 0 : index
    %c0_2 = arith.constant 0 : index
    %3 = vector.load %arg3[%c0, %c0_1, %c0_2] : memref<1x4x256xf32, #tpu.memory_space<vmem>>, vector<1x4x256xf32>
    %c0_3 = arith.constant 0 : index
    %c0_4 = arith.constant 0 : index
    %4 = vector.load %arg5[%c0_3, %c0_4] : memref<1x4xf32, #tpu.memory_space<vmem>>, vector<1x4xf32>
    %cst = arith.constant dense<0xFF800000> : vector<1x4xf32>
    %5 = vector.multi_reduction <maximumf>, %3, %cst [2] : vector<1x4x256xf32> to vector<1x4xf32>
    %6 = arith.maximumf %4, %5 : vector<1x4xf32>
    %c0_5 = arith.constant 0 : index
    %c0_6 = arith.constant 0 : index
    %7 = vector.load %arg5[%c0_5, %c0_6] : memref<1x4xf32, #tpu.memory_space<vmem>>, vector<1x4xf32>
    tpu.vector_store %arg5[%c0_5, %c0_6], %6 {strides = array<i32>} : memref<1x4xf32, #tpu.memory_space<vmem>>, vector<1x4xf32>,
    %c0_7 = arith.constant 0 : index
    %c0_8 = arith.constant 0 : index
    %8 = vector.load %arg6[%c0_7, %c0_8] : memref<1x4xf32, #tpu.memory_space<vmem>>, vector<1x4xf32>
    %cst_9 = arith.constant dense<0.000000e+00> : vector<1x4xf32>
    %9 = vector.multi_reduction <add>, %3, %cst_9 [2] : vector<1x4x256xf32> to vector<1x4xf32>
    %10 = arith.addf %8, %9 : vector<1x4xf32>
    %c0_10 = arith.constant 0 : index
    %c0_11 = arith.constant 0 : index
    %11 = vector.load %arg6[%c0_10, %c0_11] : memref<1x4xf32, #tpu.memory_space<vmem>>, vector<1x4xf32>
    tpu.vector_store %arg6[%c0_10, %c0_11], %10 {strides = array<i32>} : memref<1x4xf32, #tpu.memory_space<vmem>>, vector<1x4xf32>,
    %c0_i32_12 = arith.constant 0 : i32
    %12 = arith.cmpi eq, %arg2, %c0_i32_12 : i32
    %13 = arith.extui %12 : i1 to i32
    %c0_i32_13 = arith.constant 0 : i32
    %14 = arith.cmpi ne, %13, %c0_i32_13 : i32
    scf.if %14 {
      %c0_14 = arith.constant 0 : index
      %c0_15 = arith.constant 0 : index
      %15 = vector.load %arg5[%c0_14, %c0_15] : memref<1x4xf32, #tpu.memory_space<vmem>>, vector<1x4xf32>
      %c0_16 = arith.constant 0 : index
      %c0_17 = arith.constant 0 : index
      %16 = vector.load %arg6[%c0_16, %c0_17] : memref<1x4xf32, #tpu.memory_space<vmem>>, vector<1x4xf32>
      %cst_18 = arith.constant 3.906250e-03 : f32
      %17 = vector.broadcast %cst_18 : f32 to vector<1x4xf32>
      %18 = arith.mulf %16, %17 : vector<1x4xf32>
      %19 = tpu.concatenate %15, %18 in 0 : vector<1x4xf32>, vector<1x4xf32> -> vector<2x4xf32>
      %20 = vector.shape_cast %19 : vector<2x4xf32> to vector<1x2x4xf32>
      %c0_19 = arith.constant 0 : index
      %c0_20 = arith.constant 0 : index
      %c0_21 = arith.constant 0 : index
      %21 = vector.load %arg4[%c0_19, %c0_20, %c0_21] : memref<1x2x4xf32, #tpu.memory_space<vmem>>, vector<1x2x4xf32>
      tpu.vector_store %arg4[%c0_19, %c0_20, %c0_21], %20 {strides = array<i32>} : memref<1x2x4xf32, #tpu.memory_space<vmem>>, vector<1x2x4xf32>,
    } else {
    }
    return
  }
  func.func @transform_0(%arg0: i32, %arg1: i32, %arg2: i32) -> (i32, i32, i32) {
    %c0_i32 = arith.constant 0 : i32
    return %arg0, %arg1, %arg2 : i32, i32, i32
  }
  func.func @transform_1(%arg0: i32, %arg1: i32, %arg2: i32) -> (i32, i32, i32) {
    %c0_i32 = arith.constant 0 : i32
    %c0_i32_0 = arith.constant 0 : i32
    return %arg0, %c0_i32, %arg1 : i32, i32, i32
  }
}

</mosaic_0001>

<bundles_post_ra>
// kernel: tpu_custom_call.1
= control target key start
LH: loop header
LB: loop body
LE: loop exit
PB: predicated region body
PF: predicated region fallthrough
CT: control target
= control target key end

     0   :  { %6 = vsyncpa [#allocation5], 0  ;;  %s793_s0 = inlined_call_operand.hbm [shape: f32[2,4,256], index: 0, kind: input, shape index: {}]   ;;  %s794_s1 = inlined_call_operand.hbm [shape: f32[2,2,4], index: 1, kind: output, shape index: {}]  }
   0x1   :  { %8 = vsyncpa [#allocation5 + $0x1], 0 }
   0x2   :  { %9 = vsyncpa [#allocation6], 0 }
   0x3   :  { %11 = vsyncpa [#allocation6 + $0x1], 0  ;;  %s648_s6 = smov 0   ;;  %s650_s7 = smov 0  }
   0x4   :  { %s652_s8 = smov 0   ;;  %s654_s9 = smov 0  }
   0x5   :  { %s656_s10 = smov 0   ;;  %s658_s11 = smov 0  }
   0x6 LB: > { %s438_s12 = sadd.s32 4294967295, %s630_s11   ;;  %s439_s13 = sadd.s32 4294967294, %s630_s11   ;;  %s630_s11 = sphi %s658_s11, %s17_s11   ;;  %s626_s10 = sphi %s656_s10, %s806_s10   ;;  %s622_s9 = sphi %s654_s9, %s805_s9   ;;  %s618_s8 = sphi %s652_s8, %s804_s8   ;;  %s614_s7 = sphi %s650_s7, %s803_s7   ;;  %s610_s6 = sphi %s648_s6, %s802_s6  }
   0x7   : > { %s36_s14 = sadd.s32 1, %s626_s10  ;;  %s47_s15 = sadd.s32 1, %s618_s8 }
   0x8   : > { %p38_p0 = scmp.ge.s32.totalorder %s36_s14, 2  ;;  %p54_p1 = scmp.ne.s32.totalorder %s618_s8, %s614_s7 }
   0x9   : > { %p55_p2 = scmp.eq.s32.totalorder %s630_s11, 0  ;;  %p60_p3 = scmp.ne.s32.totalorder %s614_s7, %s610_s6 }
   0xa   : > { %s808_s14 = smov (%p38_p0, %s36_s14), 0  ;;  %p61_p5 = scmp.eq.s32.totalorder %s438_s12, 0 }
   0xb   : > { %p689_p4 = por %p55_p2, %p54_p1  ;;  %s40_s17 = ssub.s32 %s626_s10, %s808_s14 }
   0xc   : > { %p86_p6 = scmp.eq.s32.totalorder %s438_s12, 1  ;;  %p45_p7 = scmp.eq.s32.totalorder %s40_s17, 0 }
   0xd   : > { %p695_p8 = por %p61_p5, %p60_p3  ;;  %p92_p10 = scmp.eq.s32.totalorder %s439_s13, 1 }
   0xe   : > { %p699_p9 = por %p86_p6, %p54_p1  ;;  %p465_p13 = scmp.lt.s32.totalorder %s630_s11, 2 }
   0xf   : > { %s704_s20 = scalar_select %p45_p7, %s618_s8, %s47_s15  }
  0x10   : > { %p706_p11 = por %p92_p10, %p60_p3  ;;  %s112_s22 = sand.u32 1, %s618_s8  }
  0x11   : > { %s442_s23 = sshll.u32 %s112_s22, 3  ;;  %s452_s24 = sshll.u32 %s626_s10, 7 }
  0x12   : > { %s798_s21 = scalar_select %p706_p11, 1, 0 }
  0x13   : > { %s126_s27 = scalar_lea.hbm %s793_s0, %s452_s24  ;;  %s116_s28 = scalar_lea.vmem [#allocation4], %s442_s23 }
  0x14   : > { %s128_s29 = sshll.u32 %s116_s28, 4  ;;  %p719_p0 = pnand %p465_p13, %p689_p4  ;;  %s129_s29 = int_to_ptr.vmem [resolvable:$true] %s128_s29 }
  0x15   : > { %p445_p1 = scmp.ge.s32.totalorder %s630_s11, 1  ;;  %p133_p2 = scmp.lt.s32.totalorder %s630_s11, 3 }
  0x16   : > { %s113_s2 = scalar_lea.sflag [#allocation5], %s112_s22  ;;  %p524_p3 = pneg %p719_p0 }
  0x17   : > { %s535_s3 = scalar_lea.vmem %s129_s29, 128  ;;  %s632_s4 = smov [#allocation4]  }
  0x18   : > { %p536_p5 = scmp.ne.s32.totalorder %s129_s29, %s535_s3  ;;  %s540_s5 = sshll.u32 %s632_s4, 4  ;;  %s541_s5 = int_to_ptr.vmem [resolvable:$false] %s540_s5 }
  0x19   : > { %s542_s12 = scalar_lea.vmem %s541_s5, 256  ;;  %p543_p10 = scmp.lt.s32.totalorder %s129_s29, %s541_s5 }
  0x1a   : > { %p538_p6 = pnand %p536_p5, %p524_p3  ;;  %p544_p12 = scmp.lt.s32.totalorder %s542_s12, %s535_s3 }
  0x1c   : > { %p539_p7 = pneg %p538_p6  ;;  %p545_p4 = por %p544_p12, %p543_p10 }
  0x1e   : > { %p546_p13 = pnand %p545_p4, %p539_p7 }
  0x20   : > { %549 = shalt.err (!%p546_p13)
}
  0x21   : > { %460 = dma.hbm_to_vmem [thread:$0]  (!%p719_p0), %s126_s27, 128, %s129_s29, %s113_s2  }
  0x22   : > { %p134_p11 = pnand %p445_p1, %p133_p2 }
  0x23   : > { %s734_s13 = sand.u32 (!%p134_p11), 1, %s614_s7  }
  0x24   : > { %137 = sbr.rel (%p134_p11) target bundleno = 355 (0x163), region = 24  ;;  %s446_s15 = sshll.u32 (!%p134_p11), %s734_s13, 3 }
  0x25   : > { %s140_s16 = scalar_lea.sflag (!%p134_p11), [#allocation5], %s734_s13  ;;  %s143_s17 = scalar_lea.vmem (!%p134_p11), [#allocation4], %s446_s15 }
  0x29   : > { %601 = dma.done.wait (%p695_p8), %s140_s16, 128  }
  0x2a   : > { %603 = vsyncadd (%p695_p8), %s140_s16, 4294967168  ;;  %vm175_vm0 = vcmask 1043456   ;;  %v170_v0 = vld [vmem:[%s143_s17] sm:$0xff]  ;;  %v633_v8 = vmov 0   ;;  %v182_v9 = vlaneseq  ;;  %vm167_vm1 = vcmask 24576   ;;  %s447_s18 = sshll.u32 %s734_s13, 1 }
  0x2b   : > { %v173_v1 = vcombine.high %v170_v0, %v170_v0  ;;  %v250_v2 = vsel %vm175_vm0, %v170_v0, 0.0  ;;  %v176_v4 = vsel %vm175_vm0, %v170_v0, -inf  ;;  %519 = vset.pattern.permute.xlu1 %v633_v8  ;;  %520 = vset.pattern.permute.xlu0 %v633_v8  ;;  %v634_v12 = vmov 0.0   ;;  %s449_s22 = sshll.u32 %s622_s9, 5  ;;  %s161_s23 = scalar_lea.vmem [#allocation7], %s447_s18 }
  0x2c   : > { %v183_v10 = vshrl.u32 %v182_v9, 7  ;;  %v226_v11 = vand.u32 127, %v182_v9  ;;  %169 = vst.msk [vmem:[#allocation3] sm:$0x1] %vm167_vm1, %v634_v12  ;;  %v635_v14 = vmov 1966171168   ;;  %s751_s27 = scalar_lea.hbm %s794_s1, %s449_s22 }
  0x2d   : > { %v251_v3 = vsel %vm175_vm0, %v173_v1, 0.0  ;;  %v177_v5 = vsel %vm175_vm0, %v173_v1, -inf  ;;  %v201_v15 = vunpack.c.l.s4 %v635_v14  ;;  %v636_v42 = vmov -inf   ;;  %s351_s24 = sshll.u32 %s161_s23, 4  ;;  %s337_s28 = scalar_lea.sflag [#allocation6], %s734_s13  ;;  %s352_s24 = int_to_ptr.vmem [resolvable:$true] %s351_s24 }
  0x2e   : > { %v252_v6 = vadd.f32 %v251_v3, %v250_v2  ;;  %v178_v7 = vmax.f32 %v176_v4, %v177_v5  ;;  %v229_v13 = vsub.s32 %v226_v11, %v183_v10  ;;  %v184_v16 = vsub.s32 0, %v183_v10  ;;  %168 = vst.msk [vmem:[#allocation2] sm:$0x1] %vm167_vm1, %v636_v42  ;;  %s550_s29 = scalar_lea.vmem %s352_s24, 32  ;;  %s637_s9 = smov [#allocation7]  }
  0x2f   : > { %v188_v17 = vsub.s32 1, %v183_v10  ;;  %v192_v18 = vsub.s32 2, %v183_v10  ;;  %v196_v19 = vsub.s32 3, %v183_v10  ;;  %v202_v20 = vunpack.c.0.s8 %v201_v15  ;;  %p551_p8 = scmp.ne.s32.totalorder %s352_s24, %s550_s29  ;;  %s554_s30 = sshll.u32 %s637_s9, 4  ;;  %s555_s30 = int_to_ptr.vmem [resolvable:$false] %s554_s30 }
  0x30   : > { %253 = vadd.xlane.f32.xlu0 %v252_v6  ;;  %vm332_vm2 = vcmask 1040384   ;;  %vm334_vm3 = vcmask 25600   ;;  %s556_s2 = scalar_lea.vmem %s555_s30, 64  ;;  %p557_p0 = scmp.lt.s32.totalorder %s352_s24, %s555_s30 }
  0x31   : > { %v205_v26 = vsub.s32 %v202_v20, %v183_v10  ;;  %p552_p11 = pnand %p551_p8, %p699_p9  ;;  %p558_p1 = scmp.lt.s32.totalorder %s556_s2, %s550_s29 }
  0x33   : > { %v249_v48 = vld [vmem:[#allocation3] sm:$0x1]  ;;  %p553_p12 = pneg %p552_p11  ;;  %p559_p2 = por %p558_p1, %p557_p0 }
  0x34   : > { %179 = vmax.xlane.f32.xlu0 %v178_v7 }
  0x35   : > { %v171_v54 = vld [vmem:[#allocation2] sm:$0x1]  ;;  %p560_p3 = pnand %p559_p2, %p553_p12 }
  0xb9   : > { %v254_v21 = vpop.xlane.xlu0 %253 }
  0xba   : > { %v259_v22 = vrot.slane %v254_v21, %v184_v16  ;;  %v263_v23 = vrot.slane %v254_v21, %v188_v17  ;;  %v267_v24 = vrot.slane %v254_v21, %v192_v18  ;;  %v271_v25 = vrot.slane %v254_v21, %v196_v19 }
  0xbc   : > { %v272_v27 = vcombine.low %v259_v22, %v263_v23  ;;  %v273_v28 = vcombine.low %v267_v24, %v271_v25 }
  0xbd   : > { %v180_v29 = vpop.xlane.xlu0 %179 }
  0xbe   : > { %v185_v30 = vrot.slane %v180_v29, %v184_v16  ;;  %v189_v31 = vrot.slane %v180_v29, %v188_v17  ;;  %v193_v32 = vrot.slane %v180_v29, %v192_v18  ;;  %v197_v33 = vrot.slane %v180_v29, %v196_v19 }
  0xbf   : > { %v280_v34 = vrot.slane %v272_v27, %v205_v26  ;;  %v287_v35 = vrot.slane %v273_v28, %v205_v26 }
  0xc0   : > { %v198_v36 = vcombine.low %v185_v30, %v189_v31  ;;  %v199_v37 = vcombine.low %v193_v32, %v197_v33 }
  0xc1   : > { %v288_v38 = vcombine.low %v280_v34, %v287_v35 }
  0xc2   : > { %v206_v39 = vrot.slane %v198_v36, %v205_v26  ;;  %v213_v40 = vrot.slane %v199_v37, %v205_v26 }
  0xc3   : > { %v295_v41 = vrot.slane %v288_v38, %v205_v26 }
  0xc4   : > { %v214_v43 = vcombine.low %v206_v39, %v213_v40 }
  0xc5   : > { %297 = vperm.xlu1 %519, %v295_v41  }
  0xc6   : > { %v221_v44 = vrot.slane %v214_v43, %v205_v26 }
  0xc9   : > { %223 = vperm.xlu1 %519, %v221_v44  }
 0x140   : > { %v298_v45 = vpop.permute.xlu1 %297 }
 0x141   : > { %v302_v46 = vrot.slane %v298_v45, %v229_v13 }
 0x143   : > { %v309_v47 = vrot.slane %v302_v46, %v205_v26 }
 0x144   : > { %v224_v49 = vpop.permute.xlu1 %223 }
 0x145   : > { %v316_v50 = vrot.slane %v309_v47, %v205_v26  ;;  %v230_v51 = vrot.slane %v224_v49, %v229_v13 }
 0x147   : > { %v318_v52 = vadd.f32 %v316_v50, %v249_v48  ;;  %v237_v53 = vrot.slane %v230_v51, %v205_v26 }
 0x149   : > { %319 = vst.msk [vmem:[#allocation3] sm:$0x1] %vm167_vm1, %v318_v52  ;;  %v244_v55 = vrot.slane %v237_v53, %v205_v26 }
 0x14b   : > { %v246_v56 = vmax.f32 %v171_v54, %v244_v55 }
 0x14d   : > { %248 = vst.msk [vmem:[#allocation2] sm:$0x1] %vm167_vm1, %v246_v56 }
 0x150   : > { %v324_v57 = vld [vmem:[#allocation3] sm:$0x1] }
 0x151   : > { %v325_v58 = vmul.f32 0.00390625, %v324_v57 }
 0x153   : > { %v330_v59 = vrot.slane %v325_v58, %v184_v16 }
 0x154   : > { %v323_v60 = vld [vmem:[#allocation2] sm:$0x1] }
 0x155   : > { %v333_v61 = vsel %vm332_vm2, %v323_v60, %v330_v59 }
 0x156   : > { %335 = vst.msk [vmem:[%s161_s23] sm:$0x3] %vm334_vm3, %v333_v61 }
 0x157   : > { %563 = shalt.err (!%p560_p3)
}
 0x158   : > { %s564_s3 = scalar_lea.hbm %s751_s27, 32  ;;  %s568_s12 = scalar_lea.hbm %s794_s1, 64 }
 0x159   : > { %p565_p5 = scmp.ne.s32.totalorder %s751_s27, %s564_s3  ;;  %p569_p10 = scmp.lt.s32.totalorder %s751_s27, %s794_s1 }
 0x15a   : > { %p570_p4 = scmp.lt.s32.totalorder %s568_s12, %s564_s3 }
 0x15b   : > { %p566_p6 = pnand %p565_p5, %p699_p9 }
 0x15c   : > { %p571_p13 = por %p570_p4, %p569_p10 }
 0x15d   : > { %p567_p7 = pneg %p566_p6 }
 0x15f   : > { %p572_p8 = pnand %p571_p13, %p567_p7 }
 0x161   : > { %575 = shalt.err (!%p572_p8)
}
 0x162   : > { %455 = dma.vmem_to_hbm [thread:$0]  (%p699_p9), %s352_s24, 32, %s751_s27, %s337_s28  }
 0x163 PF: > { %s363_s16 = sand.u32 1, %s610_s6   ;;  %p800_p11 = scmp.ne.s32.totalorder %s798_s21, 0 }
 0x164   : > { %p801_p12 = scmp.ge.s32.totalorder %s630_s11, 2  ;;  %s364_s17 = scalar_lea.sflag [#allocation6], %s363_s16 }
 0x166   : > { %p462_p0 = pnand %p801_p12, %p800_p11 }
 0x168   : > { %p463_p1 = pneg %p462_p0 }
 0x16a   : > { %605 = dma.done.wait (%p463_p1), %s364_s17, 32  }
 0x16b   : > { %607 = vsyncadd (%p463_p1), %s364_s17, 4294967264  ;;  %s17_s11 = sadd.s32 1, %s630_s11   ;;  %s802_s6 = smov %s614_s7 }
 0x16c   : > { %p14_p2 = scmp.ge.s32.totalorder %s17_s11, 4   ;;  %s803_s7 = smov %s618_s8 }
 0x16d   : > { %s804_s8 = smov %s704_s20  ;;  %s805_s9 = smov %s626_s10 }
 0x16e   : > { %s806_s10 = smov %s808_s14  ;;  %16 = sbr.rel (!%p14_p2) target bundleno = 6 (0x6), region = 77 }
 0x173   :  { %369 = vsyncpa [#allocation5], 1 }
 0x174   :  { %371 = vsyncpa [#allocation5 + $0x1], 1 }
 0x175   :  { %372 = vsyncpa [#allocation6], 1 }
 0x176   :  { %374 = vsyncpa [#allocation6 + $0x1], 1 }

</bundles_post_ra>
